<compile_context>
chip_gen: v5e
topology: v5e:2x2
jax: 0.10.0
libtpu: 0.0.40
codegen_flags: <defaults>
</compile_context>

<pallas_src>
from functools import partial

import jax
import jax.numpy as jnp
from jax import lax
from jax.experimental import pallas as pl
from jax.experimental.pallas import tpu as pltpu


IN_FEATURES = 6
L1 = 32
L2 = 32
OUT_FEATURES = 4

DEFAULT_BLOCK_B = 16384   # rows of x / out per grid step (review: sweep 16K-64K)
CHUNK = 2048              # in-kernel sub-chunk (caps live f32 (32, chunk) temps)
PALLAS_MIN_BATCH = 512    # below this, plain XLA is cheaper than a kernel launch


def _round_up(v, m):
    return ((v + m - 1) // m) * m


def _pick_block(batch, requested):
    """Static (trace-time) batch-tile selection.

    Constraints:
      * multiple of 128 lanes (and of CHUNK when larger than CHUNK),
      * never larger than the batch (only the LAST grid block is ragged),
      * at most ceil(batch/2) so there are >= 2 grid steps whenever possible
        ("parallel" batch axis then shards across v7x's two TensorCores).
    """
    batch_floor = max(128, (batch // 128) * 128)
    half = max(128, _round_up((batch + 1) // 2, 128))
    blk = min(_round_up(requested, 128), half, batch_floor)
    if blk > CHUNK:
        blk = max(CHUNK, (blk // CHUNK) * CHUNK)
    return blk


def _mlp_kernel(x_ref, w1_ref, b1_ref, w2_ref, b2_ref, w3_ref, b3_ref, o_ref,
                *, chunk, n_chunks):
    # x_ref : (6, blk)  lane-dense batch tile
    # w1_ref: (32, 6)   b1_ref: (32, 1)
    # w2_ref: (32, 32)  b2_ref: (32, 1)
    # w3_ref: (4, 32)   b3_ref: (4, 1)
    # o_ref : (4, blk)  lane-dense output tile
    w1 = w1_ref[...]
    b1 = b1_ref[...]
    w2 = w2_ref[...]
    b2 = b2_ref[...]
    w3 = w3_ref[...]
    b3 = b3_ref[...]

    def compute(x):                       # x: (6, chunk) -> (4, chunk)
        h1 = jnp.tanh(jnp.dot(w1, x, preferred_element_type=jnp.float32) + b1)
        h2 = jnp.tanh(jnp.dot(w2, h1, preferred_element_type=jnp.float32) + b2)
        out = jnp.dot(w3, h2, preferred_element_type=jnp.float32) + b3
        # NOTE: on v6e/v7x a bf16 hidden path (bf16 tanh + bf16 MXU, f32 acc)
        # roughly doubles EUP throughput and halves VMEM; kept f32 for parity.
        return out

    if n_chunks == 1:
        o_ref[...] = compute(x_ref[...]).astype(o_ref.dtype)
    else:
        def body(c, carry):
            off = pl.multiple_of(c * chunk, chunk)
            xc = x_ref[:, pl.ds(off, chunk)]
            o_ref[:, pl.ds(off, chunk)] = compute(xc).astype(o_ref.dtype)
            return carry

        lax.fori_loop(0, n_chunks, body, 0, unroll=True)


def _pallas_call_t(x_t, prep, block_b):
    """Core Pallas call. x_t: (6, B) lane-dense -> (4, B) lane-dense."""
    w1, b1, w2, b2, w3, b3 = prep
    B = x_t.shape[1]

    blk = _pick_block(B, block_b)
    chunk = min(CHUNK, blk)
    n_chunks = blk // chunk
    grid_b = pl.cdiv(B, blk)      # ragged last block handled by Pallas masking

    flops = 2 * B * (IN_FEATURES * L1 + L1 * L2 + L2 * OUT_FEATURES)
    transcendentals = (L1 + L2) * B
    param_bytes = 4 * (L1 * IN_FEATURES + L1 + L2 * L1 + L2
                       + OUT_FEATURES * L2 + OUT_FEATURES)
    bytes_accessed = 4 * B * (IN_FEATURES + OUT_FEATURES) + param_bytes

    kernel = partial(_mlp_kernel, chunk=chunk, n_chunks=n_chunks)

    return pl.pallas_call(
        kernel,
        out_shape=jax.ShapeDtypeStruct((OUT_FEATURES, B), jnp.float32),
        grid=(grid_b,),
        in_specs=[
            pl.BlockSpec((IN_FEATURES, blk), lambda i: (0, i)),   # x tile (lane-dense)
            pl.BlockSpec((L1, IN_FEATURES), lambda i: (0, 0)),    # w1 (VMEM-resident)
            pl.BlockSpec((L1, 1), lambda i: (0, 0)),              # b1
            pl.BlockSpec((L2, L1), lambda i: (0, 0)),             # w2
            pl.BlockSpec((L2, 1), lambda i: (0, 0)),              # b2
            pl.BlockSpec((OUT_FEATURES, L2), lambda i: (0, 0)),   # w3
            pl.BlockSpec((OUT_FEATURES, 1), lambda i: (0, 0)),    # b3
        ],
        out_specs=pl.BlockSpec((OUT_FEATURES, blk), lambda i: (0, i)),
        compiler_params=pltpu.CompilerParams(
            dimension_semantics=("parallel",),
            vmem_limit_bytes=48 * 1024 * 1024,   # > 16/32 MiB defaults, < v7x 64 MiB/TC
        ),
        cost_estimate=pl.CostEstimate(
            flops=flops,
            transcendentals=transcendentals,
            bytes_accessed=bytes_accessed,
        ),
    )(x_t, w1, b1, w2, b2, w3, b3)


@partial(jax.jit, static_argnames=("block_b",))
def _pallas_forward_t(x_t, prep, block_b=DEFAULT_BLOCK_B):
    """Lane-dense entry: x_t (6, B) -> (4, B). No pad / transpose HBM passes."""
    return _pallas_call_t(x_t, prep, block_b)


@partial(jax.jit, static_argnames=("block_b",))
def _pallas_forward(x, prep, block_b=DEFAULT_BLOCK_B):
    """Module-layout entry: x (B, 6) -> (B, 4).

    The two transposes here are the only extra HBM traffic (the pad pass was
    removed); layout-aware callers should use _pallas_forward_t directly.
    """
    out_t = _pallas_call_t(x.T, prep, block_b)
    return out_t.T


@jax.jit
def _dense_forward(x, prep):
    """Plain-XLA path for tiny batches (Pallas launch overhead dominates)."""
    w1, b1, w2, b2, w3, b3 = prep
    h = jnp.tanh(x @ w1.T + b1.T)
    h = jnp.tanh(h @ w2.T + b2.T)
    return h @ w3.T + b3.T


def dyn_model_forward(x, prep, block_b=DEFAULT_BLOCK_B):
    """DynModel forward. x: (B, 6) -> (B, 4). Dispatches to Pallas for large B."""
    if x.shape[0] < PALLAS_MIN_BATCH:
        return _dense_forward(x, prep)
    return _pallas_forward(x, prep, block_b=block_b)


def dyn_model_forward_t(x_t, prep, block_b=DEFAULT_BLOCK_B):
    """Lane-dense DynModel forward. x_t: (6, B) -> (4, B)."""
    return _pallas_forward_t(x_t, prep, block_b=block_b)


def prepare_params(params):
    """One-time conversion to kernel layout (do NOT repeat per call):
    weights stay in PyTorch (out, in) layout; biases become column vectors."""
    w1, b1, w2, b2, w3, b3 = params
    return (w1, b1.reshape(-1, 1), w2, b2.reshape(-1, 1), w3, b3.reshape(-1, 1))


def init_params(key):
    """Mirrors the PyTorch module:
    - weights: nn.init.kaiming_uniform_ defaults -> bound = sqrt(6 / fan_in)
    - biases : untouched nn.Linear default -> uniform(+-1/sqrt(fan_in))."""
    ks = jax.random.split(key, 6)

    def kaiming_uniform(k, out_f, in_f):
        bound = jnp.sqrt(6.0 / in_f)
        return jax.random.uniform(k, (out_f, in_f), jnp.float32, -bound, bound)

    def bias_init(k, out_f, in_f):
        bound = 1.0 / jnp.sqrt(in_f)
        return jax.random.uniform(k, (out_f,), jnp.float32, -bound, bound)

    w1 = kaiming_uniform(ks[0], L1, IN_FEATURES)
    b1 = bias_init(ks[1], L1, IN_FEATURES)
    w2 = kaiming_uniform(ks[2], L2, L1)
    b2 = bias_init(ks[3], L2, L1)
    w3 = kaiming_uniform(ks[4], OUT_FEATURES, L2)
    b3 = bias_init(ks[5], OUT_FEATURES, L2)
    return (w1, b1, w2, b2, w3, b3)


def _reference_forward(x, params):
    w1, b1, w2, b2, w3, b3 = params
    h = jnp.tanh(x @ w1.T + b1)
    h = jnp.tanh(h @ w2.T + b2)
    return h @ w3.T + b3


if __name__ == "__main__":
    key = jax.random.PRNGKey(0)
    pkey, k1, k2, k3 = jax.random.split(key, 4)

    params = init_params(pkey)
    prep = prepare_params(params)

    # 1) Pallas path, batch not a multiple of the tile: 2 grid steps + ragged
    #    last block (no jnp.pad), single in-kernel chunk.
    x1 = jax.random.normal(k1, (1000, IN_FEATURES), jnp.float32)
    out1 = jax.block_until_ready(dyn_model_forward(x1, prep))
    ref1 = _reference_forward(x1, params)
    assert out1.shape == (1000, OUT_FEATURES)
    assert jnp.allclose(out1, ref1, atol=1e-4, rtol=1e-4)

    # 2) Larger batch through the lane-dense entry point: multi-step grid,
    #    in-kernel sub-chunk loop (n_chunks=2), ragged last block.
    x2 = jax.random.normal(k2, (9000, IN_FEATURES), jnp.float32)
    out2_t = jax.block_until_ready(dyn_model_forward_t(x2.T, prep))
    assert out2_t.shape == (OUT_FEATURES, 9000)
    assert jnp.allclose(out2_t.T, _reference_forward(x2, params), atol=1e-4, rtol=1e-4)

    # 3) Tiny batch -> dense dispatcher path (bypasses Pallas by design).
    x3 = jax.random.normal(k3, (8, IN_FEATURES), jnp.float32)
    out3 = jax.block_until_ready(dyn_model_forward(x3, prep))
    assert jnp.allclose(out3, _reference_forward(x3, params), atol=1e-4, rtol=1e-4)

    print("KERNEL_OK")
</pallas_src>

<mosaic_0001>
module attributes {stable_mosaic.version = 11 : i64} {
  func.func @_mlp_kernel(%arg0: i32, %arg1: memref<6x512xf32, #tpu.memory_space<vmem>>, %arg2: memref<32x6xf32, #tpu.memory_space<vmem>>, %arg3: memref<32x1xf32, #tpu.memory_space<vmem>>, %arg4: memref<32x32xf32, #tpu.memory_space<vmem>>, %arg5: memref<32x1xf32, #tpu.memory_space<vmem>>, %arg6: memref<4x32xf32, #tpu.memory_space<vmem>>, %arg7: memref<4x1xf32, #tpu.memory_space<vmem>>, %arg8: memref<4x512xf32, #tpu.memory_space<vmem>>) attributes {dimension_semantics = [#tpu.dimension_semantics<parallel>], iteration_bounds = array<i64: 2>, scalar_prefetch = 0 : i64, scratch_operands = 0 : i64, tpu.core_type = #tpu.core_type<tc>, window_params = [{transform_indices = @transform_0, window_bounds = array<i64: 6, 512>}, {pipeline_mode = #tpu.pipeline_mode<synchronous>, transform_indices = @transform_1, window_bounds = array<i64: 32, 6>}, {pipeline_mode = #tpu.pipeline_mode<synchronous>, transform_indices = @transform_2, window_bounds = array<i64: 32, 1>}, {pipeline_mode = #tpu.pipeline_mode<synchronous>, transform_indices = @transform_3, window_bounds = array<i64: 32, 32>}, {pipeline_mode = #tpu.pipeline_mode<synchronous>, transform_indices = @transform_4, window_bounds = array<i64: 32, 1>}, {pipeline_mode = #tpu.pipeline_mode<synchronous>, transform_indices = @transform_5, window_bounds = array<i64: 4, 32>}, {pipeline_mode = #tpu.pipeline_mode<synchronous>, transform_indices = @transform_6, window_bounds = array<i64: 4, 1>}, {transform_indices = @transform_7, window_bounds = array<i64: 4, 512>}]} {
    %c0 = arith.constant 0 : index
    %c0_0 = arith.constant 0 : index
    %0 = vector.load %arg2[%c0, %c0_0] : memref<32x6xf32, #tpu.memory_space<vmem>>, vector<32x6xf32>
    %c0_1 = arith.constant 0 : index
    %c0_2 = arith.constant 0 : index
    %1 = vector.load %arg3[%c0_1, %c0_2] : memref<32x1xf32, #tpu.memory_space<vmem>>, vector<32x1xf32>
    %c0_3 = arith.constant 0 : index
    %c0_4 = arith.constant 0 : index
    %2 = vector.load %arg4[%c0_3, %c0_4] : memref<32x32xf32, #tpu.memory_space<vmem>>, vector<32x32xf32>
    %c0_5 = arith.constant 0 : index
    %c0_6 = arith.constant 0 : index
    %3 = vector.load %arg5[%c0_5, %c0_6] : memref<32x1xf32, #tpu.memory_space<vmem>>, vector<32x1xf32>
    %c0_7 = arith.constant 0 : index
    %c0_8 = arith.constant 0 : index
    %4 = vector.load %arg6[%c0_7, %c0_8] : memref<4x32xf32, #tpu.memory_space<vmem>>, vector<4x32xf32>
    %c0_9 = arith.constant 0 : index
    %c0_10 = arith.constant 0 : index
    %5 = vector.load %arg7[%c0_9, %c0_10] : memref<4x1xf32, #tpu.memory_space<vmem>>, vector<4x1xf32>
    %c0_11 = arith.constant 0 : index
    %c0_12 = arith.constant 0 : index
    %6 = vector.load %arg1[%c0_11, %c0_12] : memref<6x512xf32, #tpu.memory_space<vmem>>, vector<6x512xf32>
    %cst = arith.constant dense<0.000000e+00> : vector<32x512xf32>
    %7 = tpu.matmul %0, %6, %cst {dimension_numbers = #tpu.dot_dimension_numbers<[1], [0], [0], [1], [0, 0, 1, 1], [], []>} : vector<32x6xf32>, vector<6x512xf32>, vector<32x512xf32> -> vector<32x512xf32>
    %8 = vector.broadcast %1 : vector<32x1xf32> to vector<32x512xf32>
    %9 = arith.addf %7, %8 : vector<32x512xf32>
    %10 = math.tanh %9 : vector<32x512xf32>
    %cst_13 = arith.constant dense<0.000000e+00> : vector<32x512xf32>
    %11 = tpu.matmul %2, %10, %cst_13 {dimension_numbers = #tpu.dot_dimension_numbers<[1], [0], [0], [1], [0, 0, 1, 1], [], []>} : vector<32x32xf32>, vector<32x512xf32>, vector<32x512xf32> -> vector<32x512xf32>
    %12 = vector.broadcast %3 : vector<32x1xf32> to vector<32x512xf32>
    %13 = arith.addf %11, %12 : vector<32x512xf32>
    %14 = math.tanh %13 : vector<32x512xf32>
    %cst_14 = arith.constant dense<0.000000e+00> : vector<4x512xf32>
    %15 = tpu.matmul %4, %14, %cst_14 {dimension_numbers = #tpu.dot_dimension_numbers<[1], [0], [0], [1], [0, 0, 1, 1], [], []>} : vector<4x32xf32>, vector<32x512xf32>, vector<4x512xf32> -> vector<4x512xf32>
    %16 = vector.broadcast %5 : vector<4x1xf32> to vector<4x512xf32>
    %17 = arith.addf %15, %16 : vector<4x512xf32>
    %c0_15 = arith.constant 0 : index
    %c0_16 = arith.constant 0 : index
    %18 = vector.load %arg8[%c0_15, %c0_16] : memref<4x512xf32, #tpu.memory_space<vmem>>, vector<4x512xf32>
    tpu.vector_store %arg8[%c0_15, %c0_16], %17 {strides = array<i32>} : memref<4x512xf32, #tpu.memory_space<vmem>>, vector<4x512xf32>,
    return
  }
  func.func @transform_0(%arg0: i32) -> (i32, i32) {
    %c0_i32 = arith.constant 0 : i32
    %c0_i32_0 = arith.constant 0 : i32
    return %c0_i32, %arg0 : i32, i32
  }
  func.func @transform_1(%arg0: i32) -> (i32, i32) {
    %c0_i32 = arith.constant 0 : i32
    %c0_i32_0 = arith.constant 0 : i32
    %c0_i32_1 = arith.constant 0 : i32
    return %c0_i32, %c0_i32_0 : i32, i32
  }
  func.func @transform_2(%arg0: i32) -> (i32, i32) {
    %c0_i32 = arith.constant 0 : i32
    %c0_i32_0 = arith.constant 0 : i32
    %c0_i32_1 = arith.constant 0 : i32
    return %c0_i32, %c0_i32_0 : i32, i32
  }
  func.func @transform_3(%arg0: i32) -> (i32, i32) {
    %c0_i32 = arith.constant 0 : i32
    %c0_i32_0 = arith.constant 0 : i32
    %c0_i32_1 = arith.constant 0 : i32
    return %c0_i32, %c0_i32_0 : i32, i32
  }
  func.func @transform_4(%arg0: i32) -> (i32, i32) {
    %c0_i32 = arith.constant 0 : i32
    %c0_i32_0 = arith.constant 0 : i32
    %c0_i32_1 = arith.constant 0 : i32
    return %c0_i32, %c0_i32_0 : i32, i32
  }
  func.func @transform_5(%arg0: i32) -> (i32, i32) {
    %c0_i32 = arith.constant 0 : i32
    %c0_i32_0 = arith.constant 0 : i32
    %c0_i32_1 = arith.constant 0 : i32
    return %c0_i32, %c0_i32_0 : i32, i32
  }
  func.func @transform_6(%arg0: i32) -> (i32, i32) {
    %c0_i32 = arith.constant 0 : i32
    %c0_i32_0 = arith.constant 0 : i32
    %c0_i32_1 = arith.constant 0 : i32
    return %c0_i32, %c0_i32_0 : i32, i32
  }
  func.func @transform_7(%arg0: i32) -> (i32, i32) {
    %c0_i32 = arith.constant 0 : i32
    %c0_i32_0 = arith.constant 0 : i32
    return %c0_i32, %arg0 : i32, i32
  }
}

</mosaic_0001>

<bundles_post_ra>
// kernel: _pallas_forward.1
= control target key start
LH: loop header
LB: loop body
LE: loop exit
PB: predicated region body
PF: predicated region fallthrough
CT: control target
= control target key end

     0   :  { %12 = vsyncpa [#allocation3], 0  ;;  %s1263_s0 = inlined_call_operand.vmem [shape: f32[6,1000], index: 0, kind: input, shape index: {}]   ;;  %s1264_s1 = inlined_call_operand.vmem [shape: f32[32,6], index: 1, kind: input, shape index: {}]   ;;  %s1265_s2 = inlined_call_operand.vmem [shape: f32[32,1], index: 2, kind: input, shape index: {}]   ;;  %s1266_s3 = inlined_call_operand.vmem [shape: f32[32,32], index: 3, kind: input, shape index: {}]   ;;  %s1267_s4 = inlined_call_operand.vmem [shape: f32[32,1], index: 4, kind: input, shape index: {}]   ;;  %s1268_s5 = inlined_call_operand.vmem [shape: f32[4,32], index: 5, kind: input, shape index: {}]   ;;  %s1269_s6 = inlined_call_operand.vmem [shape: f32[4,1], index: 6, kind: input, shape index: {}]   ;;  %s1270_s7 = inlined_call_operand.hbm [shape: f32[4,1000], index: 7, kind: output, shape index: {}]  }
   0x1   :  { %14 = vsyncpa [#allocation3 + $0x1], 0  ;;  %s1087_s24 = smov 0   ;;  %s1089_s25 = smov 0  }
   0x2   :  { %s1091_s26 = smov 0   ;;  %s1093_s27 = smov 0  }
   0x3 LB: > { %s1108_s28 = sadd.s32 4294967295, %s1044_s27   ;;  %s822_s29 = sadd.s32 4294967294, %s1044_s27   ;;  %s1044_s27 = sphi %s1093_s27, %s1276_s27   ;;  %s1040_s26 = sphi %s1091_s26, %s1275_s26   ;;  %s1036_s25 = sphi %s1089_s25, %s1274_s25   ;;  %s1032_s24 = sphi %s1087_s24, %s1273_s24  }
   0x4   : > { %s1112_s30 = sadd.s32 1, %s1044_s27   ;;  %s179_s8 = sadd.s32 1, %s1040_s26 }
   0x5   : > { %s176_s9 = ssub.s32 %s1044_s27, %s1112_s30  ;;  %p189_p0 = scmp.ne.s32.totalorder %s1040_s26, %s1036_s25 }
   0x6   : > { %p177_p1 = scmp.eq.s32.totalorder %s176_s9, 0  ;;  %p190_p2 = scmp.eq.s32.totalorder %s1108_s28, 1 }
   0x7   : > { %p195_p3 = scmp.ne.s32.totalorder %s1036_s25, %s1032_s24  ;;  %p196_p4 = scmp.eq.s32.totalorder %s822_s29, 1 }
   0x8   : > { %s1123_s10 = scalar_select %p177_p1, %s1040_s26, %s179_s8  }
   0x9   : > { %p1125_p5 = por %p190_p2, %p189_p0  ;;  %p1129_p6 = por %p196_p4, %p195_p3 }
   0xa   : > { %p825_p7 = scmp.ge.s32.totalorder %s1044_s27, 1  ;;  %p241_p8 = scmp.lt.s32.totalorder %s1044_s27, 3 }
   0xc   : > { %p242_p9 = pnand %p825_p7, %p241_p8 }
   0xd   : > { %s827_s13 = sshll.u32 (!%p242_p9), %s1108_s28, 2  ;;  %s270_s9 = sand.u32 (!%p242_p9), 1, %s1036_s25  }
   0xe   : > { %245 = sbr.rel (%p242_p9) target bundleno = 511 (0x1ff), region = 48  ;;  %p274_p10 = scmp.lt.s32.totalorder (!%p242_p9), %s827_s13, 7 }
   0xf   : > { %s874_s15 = sshll.u32 (!%p242_p9), %s1108_s28, 4  ;;  %s1002_s8 = scalar_lea.hbm (!%p242_p9), %s1270_s7, 32 }
  0x13   : > { %v1046_v0 = vmov 0   ;;  %v285_v1 = vld [vmem:[%s1265_s2 + $0x8] sm:$0xff]  ;;  %v287_v2 = vld [vmem:[%s1265_s2 + $0x18] sm:$0xff]  ;;  %s1278_s13 = smov (!%p274_p10, %s827_s13), 7  ;;  %vm335_vm0 = vcmask 1045504   ;;  %v280_v3 = vld [vmem:[%s1264_s1] sm:$0xff] }
  0x14   : > { %916 = vset.pattern.permute.xlu1 %v1046_v0  ;;  %915 = vset.pattern.permute.xlu0 %v1046_v0  ;;  %s828_s18 = sshll.u32 %s1278_s13, 3  ;;  %vm322_vm1 = vcmask 48128   ;;  %v284_v8 = vld [vmem:[%s1265_s2] sm:$0xff]  ;;  %v286_v9 = vld [vmem:[%s1265_s2 + $0x10] sm:$0xff]  ;;  %v281_v10 = vld [vmem:[%s1264_s1 + $0x8] sm:$0xff]  ;;  %vm500_vm2 = vcmask 261120  }
  0x15   : > { %309 = vperm.xlu1 %916, %v285_v1   ;;  %917 = vset.pattern.permute.xlu2 %v1046_v0  ;;  %s277_s21 = scalar_lea.vmem %s1263_s0, %s828_s18  ;;  %v293_v11 = vld [vmem:[%s1267_s4 + $0x8] sm:$0xff]  ;;  %v292_v12 = vld [vmem:[%s1267_s4] sm:$0xff]  ;;  %v282_v13 = vld [vmem:[%s1264_s1 + $0x10] sm:$0xff]  ;;  %s826_s13 = sshll.u32 %s270_s9, 4  ;;  %vm739_vm3 = vcmask 1043456  }
  0x16   : > { %319 = vperm.xlu0 %915, %v287_v2   ;;  %v298_v4 = vld [vmem:[%s277_s21] sm:$0x3f]  ;;  %v299_v5 = vld [vmem:[%s277_s21 + $0x8] sm:$0x3f]  ;;  %v300_v6 = vld [vmem:[%s277_s21 + $0x10] sm:$0x3f]  ;;  %s758_s18 = scalar_lea.hbm %s1270_s7, %s874_s15 }
  0x17   : > { %829 = vmatpush.msk.msra.mxu0 %vm335_vm0, %v298_v4  ;;  %834 = vmatpush.msk.msra.mxu1 %vm335_vm0, %v299_v5  ;;  %v301_v7 = vld [vmem:[%s277_s21 + $0x18] sm:$0x3f]  ;;  %v288_v60 = vld [vmem:[%s1266_s3] sm:$0xff]  ;;  %v289_v5 = vld [vmem:[%s1266_s3 + $0x8] sm:$0xff]  ;;  %s272_s14 = scalar_lea.vmem [#allocation2], %s826_s13  ;;  %s762_s20 = sshll.u32 %s758_s18, 4  ;;  %s763_s20 = int_to_ptr.hbm [resolvable:$true] %s762_s20 }
  0x18   : > { %839 = vmatpush.msk.msra.mxu2 %vm335_vm0, %v300_v6  ;;  %844 = vmatpush.msk.msra.mxu3 %vm335_vm0, %v301_v7  ;;  %v283_v14 = vld [vmem:[%s1264_s1 + $0x18] sm:$0xff]  ;;  %v294_v6 = vld [vmem:[%s1267_s4 + $0x10] sm:$0xff]  ;;  %s760_s19 = sshll.u32 %s272_s14, 4  ;;  %s747_s21 = scalar_lea.sflag [#allocation3], %s270_s9  ;;  %s761_s19 = int_to_ptr.vmem [resolvable:$true] %s760_s19 }
  0x19   : > { %830 = vmatmul.msk.f32.vlgmr.msra.gmra.mxu0 %vm322_vm1, %v280_v3  ;;  %835 = vmatmul.msk.f32.vlgmr.msra.gmra.mxu1 %vm322_vm1, %v280_v3  ;;  %v295_v63 = vld [vmem:[%s1267_s4 + $0x18] sm:$0xff]  ;;  %v290_v7 = vld [vmem:[%s1266_s3 + $0x10] sm:$0xff]  ;;  %s996_s22 = sshra.s32 %s763_s20, 4  ;;  %s997_s22 = int_to_ptr.hbm [resolvable:$true] %s996_s22 }
  0x1a   : > { %840 = vmatmul.msk.f32.vlgmr.msra.gmra.mxu2 %vm322_vm1, %v280_v3  ;;  %845 = vmatmul.msk.f32.vlgmr.msra.gmra.mxu3 %vm322_vm1, %v280_v3  ;;  %s998_s28 = scalar_lea.hbm %s997_s22, 16  ;;  %p1003_p0 = scmp.lt.s32.totalorder %s997_s22, %s1270_s7 }
  0x1b   : > { %497 = vperm.xlu2 %917, %v295_v63   ;;  %p999_p11 = scmp.ne.s32.totalorder %s997_s22, %s998_s28  ;;  %p1004_p1 = scmp.lt.s32.totalorder %s1002_s8, %s998_s28 }
  0x1d   : > { %304 = vperm.xlu1 %916, %v284_v8   ;;  %v297_v8 = vld [vmem:[%s1269_s6] sm:$0xf]  ;;  %p1000_p12 = pnand %p999_p11, %p1125_p5  ;;  %p1005_p2 = por %p1004_p1, %p1003_p0 }
  0x1e   : > { %314 = vperm.xlu0 %915, %v286_v9   ;;  %v291_v9 = vld [vmem:[%s1266_s3 + $0x18] sm:$0xff] }
  0x1f   : > { %p1001_p13 = pneg %p1000_p12 }
  0x21   : > { %831 = vmatmul.msk.f32.gmra.mxu0 %vm322_vm1, %v281_v10  ;;  %836 = vmatmul.msk.f32.gmra.mxu1 %vm322_vm1, %v281_v10  ;;  %p1006_p3 = pnand %p1005_p2, %p1001_p13 }
  0x22   : > { %841 = vmatmul.msk.f32.gmra.mxu2 %vm322_vm1, %v281_v10  ;;  %846 = vmatmul.msk.f32.gmra.mxu3 %vm322_vm1, %v281_v10 }
  0x23   : > { %492 = vperm.xlu2 %917, %v294_v6  }
  0x25   : > { %482 = vperm.xlu1 %916, %v292_v12  }
  0x26   : > { %487 = vperm.xlu0 %915, %v293_v11  }
  0x29   : > { %832 = vmatmul.msk.f32.gmra.mxu0 %vm322_vm1, %v282_v13  ;;  %837 = vmatmul.msk.f32.gmra.mxu1 %vm322_vm1, %v282_v13 }
  0x2a   : > { %842 = vmatmul.msk.f32.gmra.mxu2 %vm322_vm1, %v282_v13  ;;  %847 = vmatmul.msk.f32.gmra.mxu3 %vm322_vm1, %v282_v13 }
  0x2b   : > { %647 = vperm.xlu2 %917, %v297_v8  }
  0x31   : > { %833 = vmatmul.msk.f32.gmra.mxu0 %vm322_vm1, %v283_v14  ;;  %838 = vmatmul.msk.f32.gmra.mxu1 %vm322_vm1, %v283_v14 }
  0x32   : > { %843 = vmatmul.msk.f32.gmra.mxu2 %vm322_vm1, %v283_v14  ;;  %848 = vmatmul.msk.f32.gmra.mxu3 %vm322_vm1, %v283_v14 }
  0x75   : > { %v498_v14 = vpop.permute.xlu2 %497 }
  0x87   : > { %v310_v21 = vpop.permute.xlu1 %309 }
  0x88   : > { %v320_v22 = vpop.permute.xlu0 %319 }
  0x8f   : > { %v305_v27 = vpop.permute.xlu1 %304 }
  0x90   : > { %v315_v34 = vpop.permute.xlu0 %314 }
  0x96   : > { %v365_v15 = vpop.f32.mrf.mxu0  ;;  %v394_v16 = vpop.f32.mrf.mxu1 }
  0x97   : > { %v366_v28 = vadd.f32 %v365_v15, %v305_v27  ;;  %v395_v39 = vadd.f32 %v394_v16, %v305_v27 }
  0x99   : > { %918 = vtanh.f32 %v366_v28  ;;  %v488_v28 = vpop.permute.xlu0 %487 }
  0x9d   : > { %v423_v17 = vpop.f32.mrf.mxu2  ;;  %v452_v18 = vpop.f32.mrf.mxu3 }
  0x9e   : > { %v368_v19 = vpop.f32.mrf.mxu0  ;;  %v397_v20 = vpop.f32.mrf.mxu1  ;;  %v424_v54 = vadd.f32 %v423_v17, %v305_v27  ;;  %v453_v56 = vadd.f32 %v452_v18, %v305_v27 }
  0x9f   : > { %v369_v29 = vadd.f32 %v368_v19, %v310_v21  ;;  %v398_v40 = vadd.f32 %v397_v20, %v310_v21  ;;  %v919_v43 = vpop.eup %918  ;;  %v493_v19 = vpop.permute.xlu2 %492 }
  0xa1   : > { %920 = vtanh.f32 %v369_v29  ;;  %v483_v29 = vpop.permute.xlu1 %482 }
  0xa5   : > { %v426_v23 = vpop.f32.mrf.mxu2  ;;  %v455_v24 = vpop.f32.mrf.mxu3 }
  0xa6   : > { %v371_v25 = vpop.f32.mrf.mxu0  ;;  %v400_v26 = vpop.f32.mrf.mxu1  ;;  %v427_v50 = vadd.f32 %v426_v23, %v310_v21  ;;  %v456_v52 = vadd.f32 %v455_v24, %v310_v21 }
  0xa7   : > { %v372_v37 = vadd.f32 %v371_v25, %v315_v34  ;;  %v401_v38 = vadd.f32 %v400_v26, %v315_v34  ;;  %v921_v47 = vpop.eup %920  ;;  %v648_v63 = vpop.permute.xlu2 %647 }
  0xad   : > { %v429_v30 = vpop.f32.mrf.mxu2  ;;  %v458_v31 = vpop.f32.mrf.mxu3 }
  0xae   : > { %v374_v32 = vpop.f32.mrf.mxu0  ;;  %v403_v33 = vpop.f32.mrf.mxu1  ;;  %v430_v44 = vadd.f32 %v429_v30, %v315_v34  ;;  %v459_v48 = vadd.f32 %v458_v31, %v315_v34 }
  0xaf   : > { %v375_v35 = vadd.f32 %v374_v32, %v320_v22  ;;  %v404_v36 = vadd.f32 %v403_v33, %v320_v22 }
  0xb1   : > { %922 = vtanh.f32 %v375_v35 }
  0xb2   : > { %924 = vtanh.f32 %v404_v36 }
  0xb3   : > { %926 = vtanh.f32 %v372_v37 }
  0xb4   : > { %928 = vtanh.f32 %v401_v38 }
  0xb5   : > { %v432_v41 = vpop.f32.mrf.mxu2  ;;  %v461_v42 = vpop.f32.mrf.mxu3  ;;  %930 = vtanh.f32 %v395_v39 }
  0xb6   : > { %v433_v45 = vadd.f32 %v432_v41, %v320_v22  ;;  %v462_v46 = vadd.f32 %v461_v42, %v320_v22  ;;  %932 = vtanh.f32 %v398_v40 }
  0xb7   : > { %v923_v49 = vpop.eup %922 }
  0xb8   : > { %934 = vtanh.f32 %v433_v45  ;;  %v925_v51 = vpop.eup %924  ;;  %525 = vmatpush.msrb.mxu0 %v923_v49 }
  0xb9   : > { %936 = vtanh.f32 %v462_v46  ;;  %v927_v53 = vpop.eup %926  ;;  %554 = vmatpush.msrb.mxu1 %v925_v51 }
  0xba   : > { %938 = vtanh.f32 %v430_v44  ;;  %v929_v55 = vpop.eup %928  ;;  %526 = vmatpush.msrb.mxu0 %v927_v53 }
  0xbb   : > { %940 = vtanh.f32 %v459_v48  ;;  %v931_v57 = vpop.eup %930  ;;  %555 = vmatpush.msrb.mxu1 %v929_v55  ;;  %v296_v48 = vld [vmem:[%s1268_s5] sm:$0xf] }
  0xbc   : > { %942 = vtanh.f32 %v427_v50  ;;  %v933_v58 = vpop.eup %932  ;;  %527 = vmatpush.msrb.mxu0 %v921_v47 }
  0xbd   : > { %944 = vtanh.f32 %v456_v52  ;;  %556 = vmatpush.msrb.mxu1 %v933_v58 }
  0xbe   : > { %v935_v59 = vpop.eup %934  ;;  %946 = vtanh.f32 %v424_v54  ;;  %528 = vmatpush.msrb.mxu0 %v919_v43 }
  0xbf   : > { %v937_v61 = vpop.eup %936  ;;  %948 = vtanh.f32 %v453_v56  ;;  %583 = vmatpush.msrb.mxu2 %v935_v59  ;;  %557 = vmatpush.msrb.mxu1 %v931_v57 }
  0xc0   : > { %v939_v62 = vpop.eup %938  ;;  %612 = vmatpush.msrb.mxu3 %v937_v61  ;;  %849 = vmatmul.msk.f32.vlgmr.msrb.gmra.mxu0 %vm500_vm2, %v288_v60 }
  0xc1   : > { %v941_v0 = vpop.eup %940  ;;  %853 = vmatmul.msk.f32.vlgmr.msrb.gmra.mxu1 %vm500_vm2, %v288_v60  ;;  %584 = vmatpush.msrb.mxu2 %v939_v62 }
  0xc2   : > { %v943_v1 = vpop.eup %942  ;;  %613 = vmatpush.msrb.mxu3 %v941_v0 }
  0xc3   : > { %v945_v2 = vpop.eup %944  ;;  %585 = vmatpush.msrb.mxu2 %v943_v1 }
  0xc4   : > { %v947_v3 = vpop.eup %946  ;;  %614 = vmatpush.msrb.mxu3 %v945_v2 }
  0xc5   : > { %v949_v4 = vpop.eup %948  ;;  %586 = vmatpush.msrb.mxu2 %v947_v3 }
  0xc6   : > { %615 = vmatpush.msrb.mxu3 %v949_v4  ;;  %857 = vmatmul.msk.f32.vlgmr.msrb.gmra.mxu2 %vm500_vm2, %v288_v60 }
  0xc7   : > { %861 = vmatmul.msk.f32.vlgmr.msrb.gmra.mxu3 %vm500_vm2, %v288_v60 }
  0xc8   : > { %850 = vmatmul.msk.f32.gmra.mxu0 %vm500_vm2, %v289_v5 }
  0xc9   : > { %854 = vmatmul.msk.f32.gmra.mxu1 %vm500_vm2, %v289_v5 }
  0xce   : > { %858 = vmatmul.msk.f32.gmra.mxu2 %vm500_vm2, %v289_v5 }
  0xcf   : > { %862 = vmatmul.msk.f32.gmra.mxu3 %vm500_vm2, %v289_v5 }
  0xd0   : > { %851 = vmatmul.msk.f32.gmra.mxu0 %vm500_vm2, %v290_v7 }
  0xd1   : > { %855 = vmatmul.msk.f32.gmra.mxu1 %vm500_vm2, %v290_v7 }
  0xd6   : > { %859 = vmatmul.msk.f32.gmra.mxu2 %vm500_vm2, %v290_v7 }
  0xd7   : > { %863 = vmatmul.msk.f32.gmra.mxu3 %vm500_vm2, %v290_v7 }
  0xd8   : > { %852 = vmatmul.msk.f32.gmra.mxu0 %vm500_vm2, %v291_v9 }
  0xd9   : > { %856 = vmatmul.msk.f32.gmra.mxu1 %vm500_vm2, %v291_v9 }
  0xde   : > { %860 = vmatmul.msk.f32.gmra.mxu2 %vm500_vm2, %v291_v9 }
  0xdf   : > { %864 = vmatmul.msk.f32.gmra.mxu3 %vm500_vm2, %v291_v9 }
 0x13d   : > { %v530_v10 = vpop.f32.mrf.mxu0 }
 0x13e   : > { %v559_v11 = vpop.f32.mrf.mxu1  ;;  %v531_v34 = vadd.f32 %v530_v10, %v483_v29 }
 0x13f   : > { %v560_v35 = vadd.f32 %v559_v11, %v483_v29 }
 0x145   : > { %v533_v12 = vpop.f32.mrf.mxu0 }
 0x146   : > { %v562_v13 = vpop.f32.mrf.mxu1  ;;  %v534_v30 = vadd.f32 %v533_v12, %v488_v28 }
 0x147   : > { %v563_v31 = vadd.f32 %v562_v13, %v488_v28 }
 0x149   : > { %v588_v15 = vpop.f32.mrf.mxu2 }
 0x14a   : > { %v617_v16 = vpop.f32.mrf.mxu3  ;;  %v589_v53 = vadd.f32 %v588_v15, %v483_v29 }
 0x14b   : > { %v618_v54 = vadd.f32 %v617_v16, %v483_v29 }
 0x14d   : > { %v536_v17 = vpop.f32.mrf.mxu0 }
 0x14e   : > { %v565_v18 = vpop.f32.mrf.mxu1  ;;  %v537_v22 = vadd.f32 %v536_v17, %v493_v19 }
 0x14f   : > { %v566_v23 = vadd.f32 %v565_v18, %v493_v19 }
 0x150   : > { %950 = vtanh.f32 %v537_v22 }
 0x151   : > { %v591_v20 = vpop.f32.mrf.mxu2  ;;  %952 = vtanh.f32 %v566_v23 }
 0x152   : > { %v620_v21 = vpop.f32.mrf.mxu3  ;;  %v592_v50 = vadd.f32 %v591_v20, %v488_v28 }
 0x153   : > { %v621_v52 = vadd.f32 %v620_v21, %v488_v28 }
 0x155   : > { %v539_v24 = vpop.f32.mrf.mxu0 }
 0x156   : > { %v568_v25 = vpop.f32.mrf.mxu1  ;;  %v540_v26 = vadd.f32 %v539_v24, %v498_v14  ;;  %v951_v36 = vpop.eup %950 }
 0x157   : > { %v569_v27 = vadd.f32 %v568_v25, %v498_v14  ;;  %v953_v37 = vpop.eup %952 }
 0x158   : > { %954 = vtanh.f32 %v540_v26 }
 0x159   : > { %956 = vtanh.f32 %v569_v27  ;;  %v594_v32 = vpop.f32.mrf.mxu2 }
 0x15a   : > { %v623_v33 = vpop.f32.mrf.mxu3  ;;  %958 = vtanh.f32 %v534_v30  ;;  %v595_v43 = vadd.f32 %v594_v32, %v493_v19 }
 0x15b   : > { %960 = vtanh.f32 %v563_v31  ;;  %v624_v47 = vadd.f32 %v623_v33, %v493_v19 }
 0x15c   : > { %962 = vtanh.f32 %v531_v34 }
 0x15d   : > { %964 = vtanh.f32 %v560_v35 }
 0x15e   : > { %v955_v38 = vpop.eup %954 }
 0x15f   : > { %v957_v39 = vpop.eup %956  ;;  %665 = vmatpush.msra.mxu0 %v955_v38 }
 0x160   : > { %685 = vmatpush.msra.mxu1 %v957_v39  ;;  %v959_v42 = vpop.eup %958 }
 0x161   : > { %v597_v40 = vpop.f32.mrf.mxu2  ;;  %666 = vmatpush.msra.mxu0 %v951_v36  ;;  %v961_v46 = vpop.eup %960 }
 0x162   : > { %v626_v41 = vpop.f32.mrf.mxu3  ;;  %v598_v44 = vadd.f32 %v597_v40, %v498_v14  ;;  %686 = vmatpush.msra.mxu1 %v953_v37  ;;  %v963_v49 = vpop.eup %962 }
 0x163   : > { %v627_v45 = vadd.f32 %v626_v41, %v498_v14  ;;  %667 = vmatpush.msra.mxu0 %v959_v42  ;;  %v965_v51 = vpop.eup %964 }
 0x164   : > { %966 = vtanh.f32 %v598_v44  ;;  %687 = vmatpush.msra.mxu1 %v961_v46 }
 0x165   : > { %968 = vtanh.f32 %v627_v45  ;;  %668 = vmatpush.msra.mxu0 %v963_v49 }
 0x166   : > { %970 = vtanh.f32 %v595_v43  ;;  %688 = vmatpush.msra.mxu1 %v965_v51  ;;  %865 = vmatmul.msk.f32.vlgmr.msra.gmra.mxu0 %vm500_vm2, %v296_v48 }
 0x167   : > { %972 = vtanh.f32 %v624_v47  ;;  %866 = vmatmul.msk.f32.vlgmr.msra.gmra.mxu1 %vm500_vm2, %v296_v48 }
 0x168   : > { %974 = vtanh.f32 %v592_v50 }
 0x169   : > { %976 = vtanh.f32 %v621_v52 }
 0x16a   : > { %v967_v55 = vpop.eup %966  ;;  %978 = vtanh.f32 %v589_v53 }
 0x16b   : > { %v969_v56 = vpop.eup %968  ;;  %980 = vtanh.f32 %v618_v54  ;;  %705 = vmatpush.msra.mxu2 %v967_v55 }
 0x16c   : > { %v971_v57 = vpop.eup %970  ;;  %725 = vmatpush.msra.mxu3 %v969_v56 }
 0x16d   : > { %v973_v58 = vpop.eup %972  ;;  %706 = vmatpush.msra.mxu2 %v971_v57 }
 0x16e   : > { %v975_v59 = vpop.eup %974  ;;  %726 = vmatpush.msra.mxu3 %v973_v58 }
 0x16f   : > { %v977_v60 = vpop.eup %976  ;;  %707 = vmatpush.msra.mxu2 %v975_v59 }
 0x170   : > { %v979_v61 = vpop.eup %978  ;;  %727 = vmatpush.msra.mxu3 %v977_v60 }
 0x171   : > { %v981_v62 = vpop.eup %980  ;;  %708 = vmatpush.msra.mxu2 %v979_v61 }
 0x172   : > { %728 = vmatpush.msra.mxu3 %v981_v62  ;;  %867 = vmatmul.msk.f32.vlgmr.msra.gmra.mxu2 %vm500_vm2, %v296_v48 }
 0x173   : > { %868 = vmatmul.msk.f32.vlgmr.msra.gmra.mxu3 %vm500_vm2, %v296_v48 }
 0x1e3   : > { %v670_v0 = vpop.f32.mrf.mxu0 }
 0x1e4   : > { %v690_v1 = vpop.f32.mrf.mxu1  ;;  %v671_v3 = vadd.f32 %v670_v0, %v648_v63 }
 0x1e5   : > { %v691_v2 = vadd.f32 %v690_v1, %v648_v63 }
 0x1e7   : > { %v737_v4 = vrot.slane %v691_v2, 4 }
 0x1e9   : > { %v740_v5 = vsel %vm739_vm3, %v671_v3, %v737_v4 }
 0x1ea   : > { %744 = vst [vmem:[%s272_s14] sm:$0xff] %v740_v5 }
 0x1f5   : > { %v710_v6 = vpop.f32.mrf.mxu2 }
 0x1f6   : > { %v730_v7 = vpop.f32.mrf.mxu3  ;;  %v711_v9 = vadd.f32 %v710_v6, %v648_v63 }
 0x1f7   : > { %v731_v8 = vadd.f32 %v730_v7, %v648_v63 }
 0x1f9   : > { %v738_v10 = vrot.slane %v731_v8, 4 }
 0x1fb   : > { %v741_v11 = vsel %vm739_vm3, %v711_v9, %v738_v10 }
 0x1fc   : > { %745 = vst [vmem:[%s272_s14 + $0x8] sm:$0xff] %v741_v11 }
 0x1fd   : > { %1009 = shalt.err (!%p1006_p3)
}
 0x1fe   : > { %875 = dma.vmem_to_hbm [thread:$0]  (%p1125_p5), %s761_s19, 256, %s763_s20, %s747_s21  }
 0x1ff PF: > { %p881_p4 = scmp.ge.s32.totalorder %s1044_s27, 2  ;;  %s774_s9 = sand.u32 1, %s1032_s24  }
 0x200   : > { %s775_s14 = scalar_lea.sflag [#allocation3], %s774_s9 }
 0x201   : > { %p878_p7 = pnand %p881_p4, %p1129_p6 }
 0x203   : > { %p879_p8 = pneg %p878_p7 }
 0x205   : > { %1027 = dma.done.wait (%p879_p8), %s775_s14, 256  }
 0x206   : > { %1029 = vsyncadd (%p879_p8), %s775_s14, 4294967040  ;;  %p17_p9 = scmp.ge.s32.totalorder %s1112_s30, 4   ;;  %s1273_s24 = smov %s1036_s25 }
 0x207   : > { %s1274_s25 = smov %s1040_s26  ;;  %s1275_s26 = smov %s1123_s10 }
 0x208   : > { %s1276_s27 = smov %s1112_s30  ;;  %19 = sbr.rel (!%p17_p9) target bundleno = 3 (0x3), region = 83 }
 0x20d   :  { %781 = vsyncpa [#allocation3], 1 }
 0x20e   :  { %783 = vsyncpa [#allocation3 + $0x1], 1 }

</bundles_post_ra>
